<compile_context>
chip_gen: v5e
topology: v5e:2x2
jax: 0.10.0
libtpu: 0.0.40
codegen_flags: <defaults>
</compile_context>

<pallas_src>
import functools

import numpy as np
import jax
import jax.numpy as jnp
from jax.experimental import pallas as pl
from jax.experimental.pallas import tpu as pltpu


_SMALL_K_UNROLL = 8      # k_max <= this: statically unroll the extraction loop
_MIN_TAIL_SEGS = 128     # a length-bucket split must leave at least this many segments
_MAX_BUCKETS = 3


def _pad_to(x, m):
    return int(-(-int(x) // m) * m)


# --------------------------------------------------------------------------- #
# Kernel
# --------------------------------------------------------------------------- #
def mil_justgt_kernel(ktile_ref, aux_ref, pred_ref, out_ref, *, k_static):
    """One lane-tile of segments.

    ktile_ref : SMEM (num_tiles,) int32  per-tile max k (fori bound; unused if k_static > 0)
    aux_ref   : (8, TS)  f32  rows: 0 len, 1 k, 2 1/k, 3 onehot[0], 4 onehot[1] (5..7 zero)
    pred_ref  : (2, Lp, TS) f32 logits  (class, position-in-segment, segment lane)
    out_ref   : (1, TS) f32  per-segment -log softmax(collated)[target]; 0 on padded lanes
    """
    Lp = pred_ref.shape[1]
    TS = pred_ref.shape[2]
    NEG = jnp.float32(-1e30)                     # finite on purpose (padded lanes)

    aux = aux_ref[...]                           # (8, TS)
    seg_len = aux[0:1, :].astype(jnp.int32)      # (1, TS)
    k = aux[1:2, :]                              # (1, TS) f32
    inv_k = aux[2:3, :]                          # host-side exact 1/k
    oh0 = aux[3:4, :]
    oh1 = aux[4:5, :]

    if k_static > 0:
        k_hi = None
    else:
        k_hi = ktile_ref[pl.program_id(0)]       # per-tile dynamic loop bound

    def topk_mean(cls):
        # softmax(z)[cls] == sigmoid(z_cls - z_other) == 0.5*(1 + tanh(d/2)):
        # one EUP tanh, no divide, nothing extra kept live across the loop.
        d = pred_ref[cls] - pred_ref[1 - cls]                    # (Lp, TS)
        p = 0.5 * jnp.tanh(0.5 * d) + 0.5
        valid = jax.lax.broadcasted_iota(jnp.int32, (Lp, TS), 0) < seg_len
        v = jnp.where(valid, p, NEG)
        zero = jnp.zeros((1, TS), jnp.float32)

        # tie-compensated max extraction: one sublane max + one tie count per
        # iteration; ties of the current max are removed in bulk and credited
        # up to the remaining budget == sort-descending top-k with duplicates.
        def body(_, carry):
            v, a, t = carry
            c = jnp.max(v, axis=0, keepdims=True)                # (1, TS)
            g = v >= c
            n = jnp.sum(jnp.where(g, 1.0, 0.0), axis=0, keepdims=True)
            take = jnp.minimum(n, jnp.maximum(k - t, 0.0))
            return jnp.where(g, NEG, v), a + take * c, t + take

        if k_static > 0:                                         # small k: static unroll
            carry = (v, zero, zero)
            for j in range(k_static):
                carry = body(j, carry)
            _, a, _ = carry
        else:                                                    # per-tile dynamic bound
            _, a, _ = jax.lax.fori_loop(0, k_hi, body, (v, zero, zero))
        return a * inv_k                                         # (1, TS)

    # classes processed sequentially: only one (Lp, TS) buffer live at a time
    col0 = topk_mean(0)
    col1 = topk_mean(1)

    # second softmax -> log-prob -> one-hot NLL (padded lanes: one-hot == 0 -> 0)
    cm = jnp.maximum(col0, col1)
    lse = cm + jnp.log(jnp.exp(col0 - cm) + jnp.exp(col1 - cm))
    out_ref[...] = -(oh0 * (col0 - lse) + oh1 * (col1 - lse))


# --------------------------------------------------------------------------- #
# Host-side packing / dispatch
# --------------------------------------------------------------------------- #
def _choose_tile(S, Lp, seg_tile):
    """Lane tile TS (multiple of 128) and padded lane count Sp (multiple of TS)."""
    if seg_tile is not None:
        TS = int(seg_tile)
        assert TS % 128 == 0
    else:
        # widest tile keeping the hot (Lp, TS) f32 buffer around <= 32 vregs ...
        TS = min(1024, max(128, (32768 // max(int(Lp), 8)) // 128 * 128))
        Sp_min = _pad_to(S, 128)
        if Sp_min < 2 * TS:          # ... while keeping >= 2 grid steps when S allows (v7x)
            TS = max(128, (Sp_min // 2 // 128) * 128)
    return TS, _pad_to(max(S, 1), TS)


def _length_buckets(plens_sorted):
    """Ranges into the length-sorted order; open a new bucket only when the remaining
    segments' padded length at least halves and the tail keeps >= _MIN_TAIL_SEGS."""
    S = int(plens_sorted.shape[0])
    bounds = [0]
    start = 0
    while len(bounds) < _MAX_BUCKETS and S - start > _MIN_TAIL_SEGS:
        drop = np.nonzero(plens_sorted[start:] <= int(plens_sorted[start]) // 2)[0]
        if drop.size == 0:
            break
        split = start + int(drop[0])
        if S - split < _MIN_TAIL_SEGS:
            break
        bounds.append(split)
        start = split
    bounds.append(S)
    return list(zip(bounds[:-1], bounds[1:]))


def _run_bucket(pred_np, pos, inv, lens, k_seg, tgt, seg_ids, seg_tile):
    """Pack one length bucket (lane-dense, one-shot scatter) and run the kernel.
    Returns the sum of per-segment losses in the bucket."""
    Sb = int(seg_ids.shape[0])
    lens_b = lens[seg_ids]
    Lp = max(8, _pad_to(lens_b.max(), 8))
    TS, Sp = _choose_tile(Sb, Lp, seg_tile)
    num_tiles = Sp // TS

    lane_of_seg = np.full(lens.shape[0], -1, np.int64)
    lane_of_seg[seg_ids] = np.arange(Sb)
    sel = lane_of_seg[inv] >= 0                       # instances in this bucket
    lanes_i = lane_of_seg[inv[sel]]
    pos_i = pos[sel]

    pred_slab = np.zeros((2, Lp, Sp), np.float32)     # class-leading, segments on lanes
    pred_slab[:, pos_i, lanes_i] = pred_np[sel].T     # vectorized scatter

    k_b = k_seg[seg_ids].astype(np.float32)
    tgt_b = tgt[seg_ids]
    aux = np.zeros((8, Sp), np.float32)
    aux[0, :Sb] = lens_b                              # padded lanes: len 0 -> all invalid
    aux[1, :] = 1.0
    aux[1, :Sb] = k_b
    aux[2, :] = 1.0
    aux[2, :Sb] = 1.0 / k_b                           # exact host-side reciprocal
    aux[3, :Sb] = (tgt_b == 0)
    aux[4, :Sb] = (tgt_b == 1)                        # padded lanes: one-hot 0 -> loss 0

    k_full = np.ones(Sp, np.float32)
    k_full[:Sb] = k_b
    ktile = k_full.reshape(num_tiles, TS).max(axis=1).astype(np.int32)
    k_max = int(ktile.max())
    k_static = k_max if k_max <= _SMALL_K_UNROLL else 0

    per_seg = pl.pallas_call(
        functools.partial(mil_justgt_kernel, k_static=k_static),
        out_shape=jax.ShapeDtypeStruct((1, Sp), jnp.float32),
        grid_spec=pltpu.PrefetchScalarGridSpec(
            num_scalar_prefetch=1,
            grid=(num_tiles,),
            in_specs=[
                pl.BlockSpec((8, TS), lambda i, kt: (0, i)),
                pl.BlockSpec((2, Lp, TS), lambda i, kt: (0, 0, i)),
            ],
            out_specs=pl.BlockSpec((1, TS), lambda i, kt: (0, i)),
        ),
        compiler_params=pltpu.CompilerParams(
            dimension_semantics=("parallel",)),
    )(jnp.asarray(ktile), jnp.asarray(aux), jnp.asarray(pred_slab))

    return jnp.sum(per_seg)


def mil_justgt_forward(y_pred, labels, segment_key, deno, seg_tile=None):
    """MIL_Loss_justGT.forward (accuracy=False): host bookkeeping + Pallas kernel."""
    if deno == 'random':
        # TODO(synk): deno == 'random' (per-segment random denominator) not implemented.
        raise NotImplementedError("deno='random' is not supported")
    deno = int(deno)

    sk = np.asarray(segment_key)
    N = sk.shape[0]
    change = np.ones(N, dtype=bool)
    change[1:] = sk[1:] != sk[:-1]
    inv = np.cumsum(change) - 1                       # torch.unique_consecutive inverse
    S = int(inv[-1]) + 1
    lens = np.bincount(inv, minlength=S)
    starts = np.concatenate([[0], np.cumsum(lens)[:-1]])
    pos = np.arange(N) - starts[inv]                  # position inside own segment

    pred_np = np.asarray(y_pred, np.float32)          # (N, 2) logits
    lab_np = np.asarray(labels)

    # target = collate(labels, deno=1) (per-segment mean) then int cast (trunc).
    # NOTE: torch does the mean in float32; this only differs when labels are
    # non-constant within a segment and the mean lands epsilon-close to an integer.
    seg_mean = np.bincount(inv, weights=lab_np.astype(np.float64), minlength=S) / lens
    tgt = seg_mean.astype(np.int64)

    k_seg = np.maximum(1, lens // deno).astype(np.int64)

    # sort segments by length (desc): gives length buckets + descending per-tile k.
    order = np.argsort(-lens, kind="stable")
    plens_sorted = np.maximum(8, ((lens[order] + 7) // 8) * 8)

    total = jnp.float32(0.0)
    for b0, b1 in _length_buckets(plens_sorted):
        total = total + _run_bucket(pred_np, pos, inv, lens, k_seg, tgt,
                                    order[b0:b1], seg_tile)
    return total / np.float32(S)


# --------------------------------------------------------------------------- #
# Pure numpy mirror of MIL_Loss_justGT.forward (accuracy=False path)
# --------------------------------------------------------------------------- #
def reference_numpy(y_pred, labels, segment_key, deno):
    pred = np.asarray(y_pred, np.float64)
    lab = np.asarray(labels, np.float64)
    sk = np.asarray(segment_key)
    e = np.exp(pred - pred.max(axis=1, keepdims=True))
    probs = e / e.sum(axis=1, keepdims=True)                # softmax(dim=1)
    change = np.ones(len(sk), bool)
    change[1:] = sk[1:] != sk[:-1]
    inv = np.cumsum(change) - 1
    S = int(inv[-1]) + 1
    collated, targets = [], []
    for s in range(S):
        x = probs[inv == s]
        k = max(1, x.shape[0] // deno)
        srt = -np.sort(-x, axis=0)                          # sort desc per column
        collated.append(srt[:k].sum(axis=0) / k)
        targets.append(int(lab[inv == s].mean()))           # collate(labels,1) + int cast
    collated = np.stack(collated)
    targets = np.array(targets)
    z = collated - collated.max(axis=1, keepdims=True)      # second softmax
    sm = np.exp(z) / np.exp(z).sum(axis=1, keepdims=True)
    logp = np.log(sm)
    onehot = np.eye(2)[targets]
    loss = (-(onehot * logp).sum(axis=1)).mean()
    return np.float32(loss)


if __name__ == "__main__":
    key = jax.random.PRNGKey(0)
    k1, k2 = jax.random.split(key)

    # ---- test 1: small deterministic example (static-unroll path, single tile) ----
    seg_lens = np.array([8, 4, 6, 6])
    segment_key = np.repeat(np.arange(seg_lens.size, dtype=np.int32), seg_lens)
    labels = np.repeat(np.array([1.0, 0.0, 1.0, 0.0], np.float32), seg_lens)
    y_pred = jax.random.normal(k1, (int(seg_lens.sum()), 2), dtype=jnp.float32)
    loss = jax.block_until_ready(mil_justgt_forward(y_pred, labels, segment_key, deno=2))
    ref = reference_numpy(np.asarray(y_pred), labels, segment_key, deno=2)
    assert np.allclose(float(loss), float(ref), atol=1e-5, rtol=1e-5), (float(loss), float(ref))

    # ---- test 2: ragged lengths + skewed k (length buckets, multi-tile grid,
    #              per-tile dynamic k bound via scalar prefetch) --------------------
    long_lens = 48 + (np.arange(16) * 5) % 17               # a few long segments
    short_lens = 3 + (np.arange(296) * 5) % 14              # many short segments
    seg_lens2 = np.concatenate([long_lens, short_lens]).astype(np.int64)
    perm = (np.arange(seg_lens2.size) * 37) % seg_lens2.size   # deterministic shuffle
    seg_lens2 = seg_lens2[perm]
    segment_key2 = np.repeat(np.arange(seg_lens2.size, dtype=np.int32), seg_lens2)
    labels2 = np.repeat((np.arange(seg_lens2.size) % 2).astype(np.float32), seg_lens2)
    y_pred2 = jax.random.normal(k2, (int(seg_lens2.sum()), 2), dtype=jnp.float32)
    loss2 = jax.block_until_ready(mil_justgt_forward(y_pred2, labels2, segment_key2, deno=2))
    ref2 = reference_numpy(np.asarray(y_pred2), labels2, segment_key2, deno=2)
    assert np.allclose(float(loss2), float(ref2), atol=5e-5, rtol=5e-5), (float(loss2), float(ref2))

    print("KERNEL_OK")
</pallas_src>

<mosaic_0001>
module attributes {stable_mosaic.version = 11 : i64} {
  func.func @mil_justgt_kernel(%arg0: i32, %arg1: memref<1xi32, #tpu.memory_space<smem>>, %arg2: memref<8x128xf32, #tpu.memory_space<vmem>>, %arg3: memref<2x8x128xf32, #tpu.memory_space<vmem>>, %arg4: memref<1x128xf32, #tpu.memory_space<vmem>>) attributes {dimension_semantics = [#tpu.dimension_semantics<parallel>], iteration_bounds = array<i64: 1>, scalar_prefetch = 1 : i64, scratch_operands = 0 : i64, tpu.core_type = #tpu.core_type<tc>, window_params = [{transform_indices = @transform_0, window_bounds = array<i64: 8, 128>}, {transform_indices = @transform_1, window_bounds = array<i64: 2, 8, 128>}, {transform_indices = @transform_2, window_bounds = array<i64: 1, 128>}]} {
    %c0 = arith.constant 0 : index
    %c0_0 = arith.constant 0 : index
    %0 = vector.load %arg2[%c0, %c0_0] : memref<8x128xf32, #tpu.memory_space<vmem>>, vector<8x128xf32>
    %1 = vector.extract_strided_slice %0 {offsets = [0, 0], sizes = [1, 128], strides = [1, 1]} : vector<8x128xf32> to vector<1x128xf32>
    %2 = arith.fptosi %1 : vector<1x128xf32> to vector<1x128xi32>
    %3 = vector.extract_strided_slice %0 {offsets = [1, 0], sizes = [1, 128], strides = [1, 1]} : vector<8x128xf32> to vector<1x128xf32>
    %4 = vector.extract_strided_slice %0 {offsets = [2, 0], sizes = [1, 128], strides = [1, 1]} : vector<8x128xf32> to vector<1x128xf32>
    %5 = vector.extract_strided_slice %0 {offsets = [3, 0], sizes = [1, 128], strides = [1, 1]} : vector<8x128xf32> to vector<1x128xf32>
    %6 = vector.extract_strided_slice %0 {offsets = [4, 0], sizes = [1, 128], strides = [1, 1]} : vector<8x128xf32> to vector<1x128xf32>
    %c0_1 = arith.constant 0 : index
    %c0_2 = arith.constant 0 : index
    %c0_3 = arith.constant 0 : index
    %7 = vector.load %arg3[%c0_1, %c0_2, %c0_3] : memref<2x8x128xf32, #tpu.memory_space<vmem>>, vector<1x8x128xf32>
    %8 = vector.shape_cast %7 : vector<1x8x128xf32> to vector<8x128xf32>
    %c1 = arith.constant 1 : index
    %c0_4 = arith.constant 0 : index
    %c0_5 = arith.constant 0 : index
    %9 = vector.load %arg3[%c1, %c0_4, %c0_5] : memref<2x8x128xf32, #tpu.memory_space<vmem>>, vector<1x8x128xf32>
    %10 = vector.shape_cast %9 : vector<1x8x128xf32> to vector<8x128xf32>
    %11 = arith.subf %8, %10 : vector<8x128xf32>
    %cst = arith.constant 5.000000e-01 : f32
    %12 = vector.broadcast %cst : f32 to vector<8x128xf32>
    %13 = arith.mulf %12, %11 : vector<8x128xf32>
    %14 = math.tanh %13 : vector<8x128xf32>
    %cst_6 = arith.constant 5.000000e-01 : f32
    %15 = vector.broadcast %cst_6 : f32 to vector<8x128xf32>
    %16 = arith.mulf %15, %14 : vector<8x128xf32>
    %cst_7 = arith.constant 5.000000e-01 : f32
    %17 = vector.broadcast %cst_7 : f32 to vector<8x128xf32>
    %18 = arith.addf %16, %17 : vector<8x128xf32>
    %19 = tpu.iota {dimensions = array<i32: 0>} : vector<8x128xi32>
    %20 = vector.broadcast %2 : vector<1x128xi32> to vector<8x128xi32>
    %21 = arith.cmpi slt, %19, %20 : vector<8x128xi32>
    %cst_8 = arith.constant -1.000000e+30 : f32
    %22 = vector.broadcast %cst_8 : f32 to vector<8x128xf32>
    %23 = arith.select %21, %18, %22 : vector<8x128xi1>, vector<8x128xf32>
    %cst_9 = arith.constant 0.000000e+00 : f32
    %24 = vector.broadcast %cst_9 : f32 to vector<1x128xf32>
    %cst_10 = arith.constant dense<0xFF800000> : vector<128xf32>
    %25 = vector.multi_reduction <maximumf>, %23, %cst_10 [0] : vector<8x128xf32> to vector<128xf32>
    %26 = vector.shape_cast %25 : vector<128xf32> to vector<1x128xf32>
    %27 = vector.broadcast %26 : vector<1x128xf32> to vector<8x128xf32>
    %28 = arith.cmpf oge, %23, %27 : vector<8x128xf32>
    %cst_11 = arith.constant 1.000000e+00 : f32
    %cst_12 = arith.constant 0.000000e+00 : f32
    %29 = vector.broadcast %cst_11 : f32 to vector<8x128xf32>
    %30 = vector.broadcast %cst_12 : f32 to vector<8x128xf32>
    %31 = arith.select %28, %29, %30 : vector<8x128xi1>, vector<8x128xf32>
    %cst_13 = arith.constant dense<0.000000e+00> : vector<128xf32>
    %32 = vector.multi_reduction <add>, %31, %cst_13 [0] : vector<8x128xf32> to vector<128xf32>
    %33 = vector.shape_cast %32 : vector<128xf32> to vector<1x128xf32>
    %34 = arith.subf %3, %24 : vector<1x128xf32>
    %cst_14 = arith.constant 0.000000e+00 : f32
    %35 = vector.broadcast %cst_14 : f32 to vector<1x128xf32>
    %36 = arith.maximumf %34, %35 : vector<1x128xf32>
    %37 = arith.minimumf %33, %36 : vector<1x128xf32>
    %cst_15 = arith.constant -1.000000e+30 : f32
    %38 = vector.broadcast %cst_15 : f32 to vector<8x128xf32>
    %39 = arith.select %28, %38, %23 : vector<8x128xi1>, vector<8x128xf32>
    %40 = arith.mulf %37, %26 : vector<1x128xf32>
    %41 = arith.addf %24, %40 : vector<1x128xf32>
    %42 = arith.addf %24, %37 : vector<1x128xf32>
    %cst_16 = arith.constant dense<0xFF800000> : vector<128xf32>
    %43 = vector.multi_reduction <maximumf>, %39, %cst_16 [0] : vector<8x128xf32> to vector<128xf32>
    %44 = vector.shape_cast %43 : vector<128xf32> to vector<1x128xf32>
    %45 = vector.broadcast %44 : vector<1x128xf32> to vector<8x128xf32>
    %46 = arith.cmpf oge, %39, %45 : vector<8x128xf32>
    %cst_17 = arith.constant 1.000000e+00 : f32
    %cst_18 = arith.constant 0.000000e+00 : f32
    %47 = vector.broadcast %cst_17 : f32 to vector<8x128xf32>
    %48 = vector.broadcast %cst_18 : f32 to vector<8x128xf32>
    %49 = arith.select %46, %47, %48 : vector<8x128xi1>, vector<8x128xf32>
    %cst_19 = arith.constant dense<0.000000e+00> : vector<128xf32>
    %50 = vector.multi_reduction <add>, %49, %cst_19 [0] : vector<8x128xf32> to vector<128xf32>
    %51 = vector.shape_cast %50 : vector<128xf32> to vector<1x128xf32>
    %52 = arith.subf %3, %42 : vector<1x128xf32>
    %cst_20 = arith.constant 0.000000e+00 : f32
    %53 = vector.broadcast %cst_20 : f32 to vector<1x128xf32>
    %54 = arith.maximumf %52, %53 : vector<1x128xf32>
    %55 = arith.minimumf %51, %54 : vector<1x128xf32>
    %cst_21 = arith.constant -1.000000e+30 : f32
    %56 = vector.broadcast %cst_21 : f32 to vector<8x128xf32>
    %57 = arith.select %46, %56, %39 : vector<8x128xi1>, vector<8x128xf32>
    %58 = arith.mulf %55, %44 : vector<1x128xf32>
    %59 = arith.addf %41, %58 : vector<1x128xf32>
    %60 = arith.addf %42, %55 : vector<1x128xf32>
    %cst_22 = arith.constant dense<0xFF800000> : vector<128xf32>
    %61 = vector.multi_reduction <maximumf>, %57, %cst_22 [0] : vector<8x128xf32> to vector<128xf32>
    %62 = vector.shape_cast %61 : vector<128xf32> to vector<1x128xf32>
    %63 = vector.broadcast %62 : vector<1x128xf32> to vector<8x128xf32>
    %64 = arith.cmpf oge, %57, %63 : vector<8x128xf32>
    %cst_23 = arith.constant 1.000000e+00 : f32
    %cst_24 = arith.constant 0.000000e+00 : f32
    %65 = vector.broadcast %cst_23 : f32 to vector<8x128xf32>
    %66 = vector.broadcast %cst_24 : f32 to vector<8x128xf32>
    %67 = arith.select %64, %65, %66 : vector<8x128xi1>, vector<8x128xf32>
    %cst_25 = arith.constant dense<0.000000e+00> : vector<128xf32>
    %68 = vector.multi_reduction <add>, %67, %cst_25 [0] : vector<8x128xf32> to vector<128xf32>
    %69 = vector.shape_cast %68 : vector<128xf32> to vector<1x128xf32>
    %70 = arith.subf %3, %60 : vector<1x128xf32>
    %cst_26 = arith.constant 0.000000e+00 : f32
    %71 = vector.broadcast %cst_26 : f32 to vector<1x128xf32>
    %72 = arith.maximumf %70, %71 : vector<1x128xf32>
    %73 = arith.minimumf %69, %72 : vector<1x128xf32>
    %cst_27 = arith.constant -1.000000e+30 : f32
    %74 = vector.broadcast %cst_27 : f32 to vector<8x128xf32>
    %75 = arith.select %64, %74, %57 : vector<8x128xi1>, vector<8x128xf32>
    %76 = arith.mulf %73, %62 : vector<1x128xf32>
    %77 = arith.addf %59, %76 : vector<1x128xf32>
    %78 = arith.addf %60, %73 : vector<1x128xf32>
    %cst_28 = arith.constant dense<0xFF800000> : vector<128xf32>
    %79 = vector.multi_reduction <maximumf>, %75, %cst_28 [0] : vector<8x128xf32> to vector<128xf32>
    %80 = vector.shape_cast %79 : vector<128xf32> to vector<1x128xf32>
    %81 = vector.broadcast %80 : vector<1x128xf32> to vector<8x128xf32>
    %82 = arith.cmpf oge, %75, %81 : vector<8x128xf32>
    %cst_29 = arith.constant 1.000000e+00 : f32
    %cst_30 = arith.constant 0.000000e+00 : f32
    %83 = vector.broadcast %cst_29 : f32 to vector<8x128xf32>
    %84 = vector.broadcast %cst_30 : f32 to vector<8x128xf32>
    %85 = arith.select %82, %83, %84 : vector<8x128xi1>, vector<8x128xf32>
    %cst_31 = arith.constant dense<0.000000e+00> : vector<128xf32>
    %86 = vector.multi_reduction <add>, %85, %cst_31 [0] : vector<8x128xf32> to vector<128xf32>
    %87 = vector.shape_cast %86 : vector<128xf32> to vector<1x128xf32>
    %88 = arith.subf %3, %78 : vector<1x128xf32>
    %cst_32 = arith.constant 0.000000e+00 : f32
    %89 = vector.broadcast %cst_32 : f32 to vector<1x128xf32>
    %90 = arith.maximumf %88, %89 : vector<1x128xf32>
    %91 = arith.minimumf %87, %90 : vector<1x128xf32>
    %92 = arith.mulf %91, %80 : vector<1x128xf32>
    %93 = arith.addf %77, %92 : vector<1x128xf32>
    %94 = arith.mulf %93, %4 : vector<1x128xf32>
    %c1_33 = arith.constant 1 : index
    %c0_34 = arith.constant 0 : index
    %c0_35 = arith.constant 0 : index
    %95 = vector.load %arg3[%c1_33, %c0_34, %c0_35] : memref<2x8x128xf32, #tpu.memory_space<vmem>>, vector<1x8x128xf32>
    %96 = vector.shape_cast %95 : vector<1x8x128xf32> to vector<8x128xf32>
    %c0_36 = arith.constant 0 : index
    %c0_37 = arith.constant 0 : index
    %c0_38 = arith.constant 0 : index
    %97 = vector.load %arg3[%c0_36, %c0_37, %c0_38] : memref<2x8x128xf32, #tpu.memory_space<vmem>>, vector<1x8x128xf32>
    %98 = vector.shape_cast %97 : vector<1x8x128xf32> to vector<8x128xf32>
    %99 = arith.subf %96, %98 : vector<8x128xf32>
    %cst_39 = arith.constant 5.000000e-01 : f32
    %100 = vector.broadcast %cst_39 : f32 to vector<8x128xf32>
    %101 = arith.mulf %100, %99 : vector<8x128xf32>
    %102 = math.tanh %101 : vector<8x128xf32>
    %cst_40 = arith.constant 5.000000e-01 : f32
    %103 = vector.broadcast %cst_40 : f32 to vector<8x128xf32>
    %104 = arith.mulf %103, %102 : vector<8x128xf32>
    %cst_41 = arith.constant 5.000000e-01 : f32
    %105 = vector.broadcast %cst_41 : f32 to vector<8x128xf32>
    %106 = arith.addf %104, %105 : vector<8x128xf32>
    %107 = tpu.iota {dimensions = array<i32: 0>} : vector<8x128xi32>
    %108 = vector.broadcast %2 : vector<1x128xi32> to vector<8x128xi32>
    %109 = arith.cmpi slt, %107, %108 : vector<8x128xi32>
    %cst_42 = arith.constant -1.000000e+30 : f32
    %110 = vector.broadcast %cst_42 : f32 to vector<8x128xf32>
    %111 = arith.select %109, %106, %110 : vector<8x128xi1>, vector<8x128xf32>
    %cst_43 = arith.constant 0.000000e+00 : f32
    %112 = vector.broadcast %cst_43 : f32 to vector<1x128xf32>
    %cst_44 = arith.constant dense<0xFF800000> : vector<128xf32>
    %113 = vector.multi_reduction <maximumf>, %111, %cst_44 [0] : vector<8x128xf32> to vector<128xf32>
    %114 = vector.shape_cast %113 : vector<128xf32> to vector<1x128xf32>
    %115 = vector.broadcast %114 : vector<1x128xf32> to vector<8x128xf32>
    %116 = arith.cmpf oge, %111, %115 : vector<8x128xf32>
    %cst_45 = arith.constant 1.000000e+00 : f32
    %cst_46 = arith.constant 0.000000e+00 : f32
    %117 = vector.broadcast %cst_45 : f32 to vector<8x128xf32>
    %118 = vector.broadcast %cst_46 : f32 to vector<8x128xf32>
    %119 = arith.select %116, %117, %118 : vector<8x128xi1>, vector<8x128xf32>
    %cst_47 = arith.constant dense<0.000000e+00> : vector<128xf32>
    %120 = vector.multi_reduction <add>, %119, %cst_47 [0] : vector<8x128xf32> to vector<128xf32>
    %121 = vector.shape_cast %120 : vector<128xf32> to vector<1x128xf32>
    %122 = arith.subf %3, %112 : vector<1x128xf32>
    %cst_48 = arith.constant 0.000000e+00 : f32
    %123 = vector.broadcast %cst_48 : f32 to vector<1x128xf32>
    %124 = arith.maximumf %122, %123 : vector<1x128xf32>
    %125 = arith.minimumf %121, %124 : vector<1x128xf32>
    %cst_49 = arith.constant -1.000000e+30 : f32
    %126 = vector.broadcast %cst_49 : f32 to vector<8x128xf32>
    %127 = arith.select %116, %126, %111 : vector<8x128xi1>, vector<8x128xf32>
    %128 = arith.mulf %125, %114 : vector<1x128xf32>
    %129 = arith.addf %112, %128 : vector<1x128xf32>
    %130 = arith.addf %112, %125 : vector<1x128xf32>
    %cst_50 = arith.constant dense<0xFF800000> : vector<128xf32>
    %131 = vector.multi_reduction <maximumf>, %127, %cst_50 [0] : vector<8x128xf32> to vector<128xf32>
    %132 = vector.shape_cast %131 : vector<128xf32> to vector<1x128xf32>
    %133 = vector.broadcast %132 : vector<1x128xf32> to vector<8x128xf32>
    %134 = arith.cmpf oge, %127, %133 : vector<8x128xf32>
    %cst_51 = arith.constant 1.000000e+00 : f32
    %cst_52 = arith.constant 0.000000e+00 : f32
    %135 = vector.broadcast %cst_51 : f32 to vector<8x128xf32>
    %136 = vector.broadcast %cst_52 : f32 to vector<8x128xf32>
    %137 = arith.select %134, %135, %136 : vector<8x128xi1>, vector<8x128xf32>
    %cst_53 = arith.constant dense<0.000000e+00> : vector<128xf32>
    %138 = vector.multi_reduction <add>, %137, %cst_53 [0] : vector<8x128xf32> to vector<128xf32>
    %139 = vector.shape_cast %138 : vector<128xf32> to vector<1x128xf32>
    %140 = arith.subf %3, %130 : vector<1x128xf32>
    %cst_54 = arith.constant 0.000000e+00 : f32
    %141 = vector.broadcast %cst_54 : f32 to vector<1x128xf32>
    %142 = arith.maximumf %140, %141 : vector<1x128xf32>
    %143 = arith.minimumf %139, %142 : vector<1x128xf32>
    %cst_55 = arith.constant -1.000000e+30 : f32
    %144 = vector.broadcast %cst_55 : f32 to vector<8x128xf32>
    %145 = arith.select %134, %144, %127 : vector<8x128xi1>, vector<8x128xf32>
    %146 = arith.mulf %143, %132 : vector<1x128xf32>
    %147 = arith.addf %129, %146 : vector<1x128xf32>
    %148 = arith.addf %130, %143 : vector<1x128xf32>
    %cst_56 = arith.constant dense<0xFF800000> : vector<128xf32>
    %149 = vector.multi_reduction <maximumf>, %145, %cst_56 [0] : vector<8x128xf32> to vector<128xf32>
    %150 = vector.shape_cast %149 : vector<128xf32> to vector<1x128xf32>
    %151 = vector.broadcast %150 : vector<1x128xf32> to vector<8x128xf32>
    %152 = arith.cmpf oge, %145, %151 : vector<8x128xf32>
    %cst_57 = arith.constant 1.000000e+00 : f32
    %cst_58 = arith.constant 0.000000e+00 : f32
    %153 = vector.broadcast %cst_57 : f32 to vector<8x128xf32>
    %154 = vector.broadcast %cst_58 : f32 to vector<8x128xf32>
    %155 = arith.select %152, %153, %154 : vector<8x128xi1>, vector<8x128xf32>
    %cst_59 = arith.constant dense<0.000000e+00> : vector<128xf32>
    %156 = vector.multi_reduction <add>, %155, %cst_59 [0] : vector<8x128xf32> to vector<128xf32>
    %157 = vector.shape_cast %156 : vector<128xf32> to vector<1x128xf32>
    %158 = arith.subf %3, %148 : vector<1x128xf32>
    %cst_60 = arith.constant 0.000000e+00 : f32
    %159 = vector.broadcast %cst_60 : f32 to vector<1x128xf32>
    %160 = arith.maximumf %158, %159 : vector<1x128xf32>
    %161 = arith.minimumf %157, %160 : vector<1x128xf32>
    %cst_61 = arith.constant -1.000000e+30 : f32
    %162 = vector.broadcast %cst_61 : f32 to vector<8x128xf32>
    %163 = arith.select %152, %162, %145 : vector<8x128xi1>, vector<8x128xf32>
    %164 = arith.mulf %161, %150 : vector<1x128xf32>
    %165 = arith.addf %147, %164 : vector<1x128xf32>
    %166 = arith.addf %148, %161 : vector<1x128xf32>
    %cst_62 = arith.constant dense<0xFF800000> : vector<128xf32>
    %167 = vector.multi_reduction <maximumf>, %163, %cst_62 [0] : vector<8x128xf32> to vector<128xf32>
    %168 = vector.shape_cast %167 : vector<128xf32> to vector<1x128xf32>
    %169 = vector.broadcast %168 : vector<1x128xf32> to vector<8x128xf32>
    %170 = arith.cmpf oge, %163, %169 : vector<8x128xf32>
    %cst_63 = arith.constant 1.000000e+00 : f32
    %cst_64 = arith.constant 0.000000e+00 : f32
    %171 = vector.broadcast %cst_63 : f32 to vector<8x128xf32>
    %172 = vector.broadcast %cst_64 : f32 to vector<8x128xf32>
    %173 = arith.select %170, %171, %172 : vector<8x128xi1>, vector<8x128xf32>
    %cst_65 = arith.constant dense<0.000000e+00> : vector<128xf32>
    %174 = vector.multi_reduction <add>, %173, %cst_65 [0] : vector<8x128xf32> to vector<128xf32>
    %175 = vector.shape_cast %174 : vector<128xf32> to vector<1x128xf32>
    %176 = arith.subf %3, %166 : vector<1x128xf32>
    %cst_66 = arith.constant 0.000000e+00 : f32
    %177 = vector.broadcast %cst_66 : f32 to vector<1x128xf32>
    %178 = arith.maximumf %176, %177 : vector<1x128xf32>
    %179 = arith.minimumf %175, %178 : vector<1x128xf32>
    %180 = arith.mulf %179, %168 : vector<1x128xf32>
    %181 = arith.addf %165, %180 : vector<1x128xf32>
    %182 = arith.mulf %181, %4 : vector<1x128xf32>
    %183 = arith.maximumf %94, %182 : vector<1x128xf32>
    %184 = arith.subf %94, %183 : vector<1x128xf32>
    %185 = math.exp %184 : vector<1x128xf32>
    %186 = arith.subf %182, %183 : vector<1x128xf32>
    %187 = math.exp %186 : vector<1x128xf32>
    %188 = arith.addf %185, %187 : vector<1x128xf32>
    %189 = math.log %188 : vector<1x128xf32>
    %190 = arith.addf %183, %189 : vector<1x128xf32>
    %191 = arith.subf %94, %190 : vector<1x128xf32>
    %192 = arith.mulf %5, %191 : vector<1x128xf32>
    %193 = arith.subf %182, %190 : vector<1x128xf32>
    %194 = arith.mulf %6, %193 : vector<1x128xf32>
    %195 = arith.addf %192, %194 : vector<1x128xf32>
    %cst_67 = arith.constant 0.000000e+00 : f32
    %196 = vector.broadcast %cst_67 : f32 to vector<1x128xf32>
    %197 = arith.subf %196, %195 : vector<1x128xf32>
    %c0_68 = arith.constant 0 : index
    %c0_69 = arith.constant 0 : index
    %198 = vector.load %arg4[%c0_68, %c0_69] : memref<1x128xf32, #tpu.memory_space<vmem>>, vector<1x128xf32>
    tpu.vector_store %arg4[%c0_68, %c0_69], %197 {strides = array<i32>} : memref<1x128xf32, #tpu.memory_space<vmem>>, vector<1x128xf32>,
    return
  }
  func.func @transform_0(%arg0: i32, %arg1: memref<1xi32, #tpu.memory_space<smem>>) -> (i32, i32) {
    %c0_i32 = arith.constant 0 : i32
    %c0_i32_0 = arith.constant 0 : i32
    return %c0_i32, %arg0 : i32, i32
  }
  func.func @transform_1(%arg0: i32, %arg1: memref<1xi32, #tpu.memory_space<smem>>) -> (i32, i32, i32) {
    %c0_i32 = arith.constant 0 : i32
    %c0_i32_0 = arith.constant 0 : i32
    %c0_i32_1 = arith.constant 0 : i32
    return %c0_i32, %c0_i32_0, %arg0 : i32, i32, i32
  }
  func.func @transform_2(%arg0: i32, %arg1: memref<1xi32, #tpu.memory_space<smem>>) -> (i32, i32) {
    %c0_i32 = arith.constant 0 : i32
    %c0_i32_0 = arith.constant 0 : i32
    return %c0_i32, %arg0 : i32, i32
  }
}

</mosaic_0001>

<bundles_post_ra>
// kernel: tpu_custom_call.1
= control target key start
LH: loop header
LB: loop body
LE: loop exit
PB: predicated region body
PF: predicated region fallthrough
CT: control target
= control target key end

     0   :  { %9 = vsyncpa [#allocation5], 0  ;;  %s467_s0 = inlined_call_operand.<no memory space> [shape: s32[1], index: 0, kind: input, shape index: {}]   ;;  %s468_s1 = inlined_call_operand.hbm [shape: f32[8,128], index: 1, kind: input, shape index: {}]   ;;  %s469_s2 = inlined_call_operand.hbm [shape: f32[2,8,128], index: 2, kind: input, shape index: {}]   ;;  %s470_s3 = inlined_call_operand.hbm [shape: f32[1,128], index: 3, kind: output, shape index: {}]  }
   0x1   :  { %10 = vsyncpa [#allocation8], 0 }
   0x2   :  { %11 = vsyncpa [#allocation6], 0  ;;  %s17_s14 = sshll.u32 %s468_s1, 4  ;;  %s375_s15 = smov [#allocation4]   ;;  %s18_s14 = int_to_ptr.hbm [resolvable:$true] %s17_s14 }
   0x3   :  { %s19_s16 = sshll.u32 %s375_s15, 4  ;;  %s27_s18 = sshll.u32 %s469_s2, 4  ;;  %s20_s16 = int_to_ptr.vmem [resolvable:$true] %s19_s16  ;;  %s28_s18 = int_to_ptr.hbm [resolvable:$true] %s27_s18 }
   0x4   :  { %22 = dma.hbm_to_vmem [thread:$0]  %s18_s14, 128, %s20_s16, [#allocation5]  }
   0x5   :  { %s376_s19 = smov [#allocation7]   ;;  %s377_s21 = smov 128  }
   0x6   :  { %s29_s20 = sshll.u32 %s376_s19, 4  ;;  %s378_s22 = smov 8   ;;  %s30_s20 = int_to_ptr.vmem [resolvable:$true] %s29_s20 }
   0x7   :  { %35 = dma.hbm_to_vmem [thread:$0]  %s28_s18, 256, %s30_s20, [#allocation8], %s377_s21, %s377_s21, %s378_s22  }
   0x8   :  { %369 = dma.done.wait [#allocation5], 128  }
   0x9   :  { %370 = vsyncadd [#allocation5], 4294967168 }
   0xa   :  { %371 = dma.done.wait [#allocation8], 256  }
   0xb   :  { %372 = vsyncadd [#allocation8], 4294967040  ;;  %v407_v0 = vld [vmem:[#allocation4] sm:$0xff]  ;;  %v46_v1 = vld [vmem:[#allocation7] sm:$0xff]  ;;  %v54_v11 = vlaneseq  ;;  %v379_v34 = vmov 0.0   ;;  %s380_s1 = smov [#allocation9]  }
   0xc   :  { %v48_v2 = vld [vmem:[#allocation7 + $0x8] sm:$0xff]  ;;  %vm276_vm0 = vcmp.lt.s32.totalorder %v407_v0, 0  ;;  %v277_v3 = vceil.f32 %v407_v0  ;;  %v278_v4 = vfloor.f32 %v407_v0  ;;  %v73_v60 = vmax.f32 %v407_v0, 0.0  ;;  %s263_s2 = sshll.u32 %s380_s1, 4  ;;  %s265_s25 = sshll.u32 %s470_s3, 4  ;;  %s264_s2 = int_to_ptr.vmem [resolvable:$true] %s263_s2  ;;  %s266_s25 = int_to_ptr.hbm [resolvable:$true] %s265_s25 }
   0xd   :  { %v49_v5 = vsub.f32 %v46_v1, %v48_v2  ;;  %v144_v6 = vsub.f32 %v48_v2, %v46_v1  ;;  %v55_v12 = vshrl.u32 %v54_v11, 7 }
   0xe   :  { %v279_v7 = vsel %vm276_vm0, %v277_v3, %v278_v4 }
   0xf   :  { %v50_v8 = vmul.f32 0.5, %v49_v5  ;;  %v145_v9 = vmul.f32 0.5, %v144_v6  ;;  %v280_v10 = vcvt.f32.s32 %v279_v7 }
  0x11   :  { %287 = vtanh.f32 %v50_v8  ;;  %v56_v13 = vperm.slane %v280_v10, 0 }
  0x12   :  { %289 = vtanh.f32 %v145_v9 }
  0x13   :  { %vm57_vm1 = vcmp.lt.s32.totalorder %v55_v12, %v56_v13 }
  0x17   :  { %v288_v14 = vpop.eup %287 }
  0x18   :  { %v290_v15 = vpop.eup %289  ;;  %v52_v16 = vmul.f32 0.5, %v288_v14 }
  0x19   :  { %v147_v17 = vmul.f32 0.5, %v290_v15 }
  0x1a   :  { %v53_v18 = vadd.f32 0.5, %v52_v16 }
  0x1b   :  { %v148_v19 = vadd.f32 0.5, %v147_v17 }
  0x1c   :  { %v58_v20 = vsel %vm57_vm1, %v53_v18, -1e+30 }
  0x1d   :  { %v59_v21 = vrot.slane %v58_v20, 4  ;;  %v149_v22 = vsel %vm57_vm1, %v148_v19, -1e+30 }
  0x1e   :  { %v150_v23 = vrot.slane %v149_v22, 4 }
  0x1f   :  { %v60_v24 = vmax.f32 %v58_v20, %v59_v21 }
  0x20   :  { %v151_v25 = vmax.f32 %v149_v22, %v150_v23 }
  0x21   :  { %v61_v26 = vrot.slane %v60_v24, 2 }
  0x22   :  { %v152_v27 = vrot.slane %v151_v25, 2 }
  0x23   :  { %v62_v28 = vmax.f32 %v60_v24, %v61_v26 }
  0x24   :  { %v153_v29 = vmax.f32 %v151_v25, %v152_v27 }
  0x25   :  { %v63_v30 = vrot.slane %v62_v28, 1 }
  0x26   :  { %v154_v31 = vrot.slane %v153_v29, 1 }
  0x27   :  { %v412_v32 = vmax.f32 %v62_v28, %v63_v30 }
  0x28   :  { %v414_v33 = vmax.f32 %v153_v29, %v154_v31 }
  0x29   :  { %vm65_vm2 = vcmp.ge.f32.partialorder %v58_v20, %v412_v32 }
  0x2a   :  { %v66_v35 = vsel %vm65_vm2, 1.0, %v379_v34  ;;  %v75_v36 = vsel %vm65_vm2, -1e+30, %v58_v20  ;;  %vm156_vm3 = vcmp.ge.f32.partialorder %v149_v22, %v414_v33 }
  0x2b   :  { %v67_v37 = vrot.slane %v66_v35, 4  ;;  %v79_v38 = vrot.slane %v75_v36, 4  ;;  %v157_v39 = vsel %vm156_vm3, 1.0, %v379_v34  ;;  %v165_v40 = vsel %vm156_vm3, -1e+30, %v149_v22 }
  0x2c   :  { %v158_v41 = vrot.slane %v157_v39, 4  ;;  %v169_v42 = vrot.slane %v165_v40, 4 }
  0x2d   :  { %v68_v43 = vadd.f32 %v67_v37, %v66_v35  ;;  %v80_v44 = vmax.f32 %v75_v36, %v79_v38 }
  0x2e   :  { %v159_v45 = vadd.f32 %v158_v41, %v157_v39  ;;  %v170_v46 = vmax.f32 %v165_v40, %v169_v42 }
  0x2f   :  { %v69_v47 = vrot.slane %v68_v43, 2  ;;  %v81_v48 = vrot.slane %v80_v44, 2 }
  0x30   :  { %v160_v49 = vrot.slane %v159_v45, 2  ;;  %v171_v50 = vrot.slane %v170_v46, 2 }
  0x31   :  { %v70_v51 = vadd.f32 %v69_v47, %v68_v43  ;;  %v82_v52 = vmax.f32 %v80_v44, %v81_v48 }
  0x32   :  { %v161_v53 = vadd.f32 %v160_v49, %v159_v45  ;;  %v172_v54 = vmax.f32 %v170_v46, %v171_v50 }
  0x33   :  { %v71_v55 = vrot.slane %v70_v51, 1  ;;  %v83_v56 = vrot.slane %v82_v52, 1 }
  0x34   :  { %v162_v57 = vrot.slane %v161_v53, 1  ;;  %v173_v58 = vrot.slane %v172_v54, 1 }
  0x35   :  { %v72_v59 = vadd.f32 %v71_v55, %v70_v51  ;;  %v421_v61 = vmax.f32 %v82_v52, %v83_v56 }
  0x36   :  { %v423_v62 = vmax.f32 %v172_v54, %v173_v58  ;;  %v163_v2 = vadd.f32 %v162_v57, %v161_v53 }
  0x37   :  { %vm85_vm4 = vcmp.ge.f32.partialorder %v75_v36, %v421_v61  ;;  %v428_v3 = vmin.f32 %v72_v59, %v73_v60 }
  0x38   :  { %v86_v63 = vsel %vm85_vm4, 1.0, %v379_v34  ;;  %v96_v1 = vsel %vm85_vm4, -1e+30, %v75_v36  ;;  %vm175_vm5 = vcmp.ge.f32.partialorder %v165_v40, %v423_v62  ;;  %v431_v11 = vmin.f32 %v163_v2, %v73_v60 }
  0x39   :  { %v87_v4 = vrot.slane %v86_v63, 4  ;;  %v100_v5 = vrot.slane %v96_v1, 4  ;;  %v176_v6 = vsel %vm175_vm5, 1.0, %v379_v34  ;;  %v186_v7 = vsel %vm175_vm5, -1e+30, %v165_v40 }
  0x3a   :  { %v177_v10 = vrot.slane %v176_v6, 4  ;;  %v190_v12 = vrot.slane %v186_v7, 4  ;;  %v93_v14 = vsub.f32 %v407_v0, %v428_v3  ;;  %v183_v21 = vsub.f32 %v407_v0, %v431_v11 }
  0x3b   :  { %v88_v8 = vadd.f32 %v87_v4, %v86_v63  ;;  %v101_v9 = vmax.f32 %v96_v1, %v100_v5 }
  0x3c   :  { %v178_v16 = vadd.f32 %v177_v10, %v176_v6  ;;  %v191_v17 = vmax.f32 %v186_v7, %v190_v12  ;;  %v94_v24 = vmax.f32 %v93_v14, 0.0  ;;  %v184_v31 = vmax.f32 %v183_v21, 0.0 }
  0x3d   :  { %v89_v13 = vrot.slane %v88_v8, 2  ;;  %v102_v15 = vrot.slane %v101_v9, 2 }
  0x3e   :  { %v179_v20 = vrot.slane %v178_v16, 2  ;;  %v192_v22 = vrot.slane %v191_v17, 2 }
  0x3f   :  { %v90_v18 = vadd.f32 %v89_v13, %v88_v8  ;;  %v103_v19 = vmax.f32 %v101_v9, %v102_v15 }
  0x40   :  { %v180_v26 = vadd.f32 %v179_v20, %v178_v16  ;;  %v193_v27 = vmax.f32 %v191_v17, %v192_v22 }
  0x41   :  { %v91_v23 = vrot.slane %v90_v18, 1  ;;  %v104_v25 = vrot.slane %v103_v19, 1 }
  0x42   :  { %v181_v30 = vrot.slane %v180_v26, 1  ;;  %v194_v35 = vrot.slane %v193_v27, 1 }
  0x43   :  { %v92_v28 = vadd.f32 %v91_v23, %v90_v18  ;;  %v437_v29 = vmax.f32 %v103_v19, %v104_v25  ;;  %v76_v23 = vmul.f32 %v428_v3, %v412_v32 }
  0x44   :  { %v182_v37 = vadd.f32 %v181_v30, %v180_v26  ;;  %v441_v40 = vmax.f32 %v193_v27, %v194_v35 }
  0x45   :  { %v95_v36 = vmin.f32 %v92_v28, %v94_v24  ;;  %vm106_vm6 = vcmp.ge.f32.partialorder %v96_v1, %v437_v29 }
  0x46   :  { %v107_v38 = vsel %vm106_vm6, 1.0, %v379_v34  ;;  %v117_v39 = vsel %vm106_vm6, -1e+30, %v96_v1  ;;  %v185_v44 = vmin.f32 %v182_v37, %v184_v31  ;;  %vm196_vm7 = vcmp.ge.f32.partialorder %v186_v7, %v441_v40 }
  0x47   :  { %v99_v41 = vadd.f32 %v95_v36, %v428_v3  ;;  %v108_v42 = vrot.slane %v107_v38, 4  ;;  %v121_v43 = vrot.slane %v117_v39, 4  ;;  %v197_v48 = vsel %vm196_vm7, 1.0, %v379_v34 }
  0x48   :  { %v207_v49 = vsel %vm196_vm7, -1e+30, %v186_v7  ;;  %v189_v52 = vadd.f32 %v185_v44, %v431_v11  ;;  %v198_v53 = vrot.slane %v197_v48, 4  ;;  %v97_v24 = vmul.f32 %v95_v36, %v421_v61 }
  0x49   :  { %v109_v45 = vadd.f32 %v108_v42, %v107_v38  ;;  %v122_v46 = vmax.f32 %v117_v39, %v121_v43  ;;  %v114_v47 = vsub.f32 %v407_v0, %v99_v41  ;;  %v211_v54 = vrot.slane %v207_v49, 4 }
  0x4a   :  { %v199_v57 = vadd.f32 %v198_v53, %v197_v48  ;;  %v204_v2 = vsub.f32 %v407_v0, %v189_v52  ;;  %v98_v37 = vadd.f32 %v97_v24, %v76_v23 }
  0x4b   :  { %v110_v50 = vrot.slane %v109_v45, 2  ;;  %v123_v51 = vrot.slane %v122_v46, 2  ;;  %v115_v58 = vmax.f32 %v114_v47, 0.0  ;;  %v212_v59 = vmax.f32 %v207_v49, %v211_v54 }
  0x4c   :  { %v200_v1 = vrot.slane %v199_v57, 2  ;;  %v205_v12 = vmax.f32 %v204_v2, 0.0 }
  0x4d   :  { %v111_v55 = vadd.f32 %v110_v50, %v109_v45  ;;  %v124_v56 = vmax.f32 %v122_v46, %v123_v51  ;;  %v213_v4 = vrot.slane %v212_v59, 2  ;;  %v141_v50 = vrot.slane %v407_v0, 1 }
  0x4e   :  { %v201_v7 = vadd.f32 %v200_v1, %v199_v57 }
  0x4f   :  { %v112_v60 = vrot.slane %v111_v55, 1  ;;  %v125_v63 = vrot.slane %v124_v56, 1  ;;  %v214_v8 = vmax.f32 %v212_v59, %v213_v4 }
  0x50   :  { %v202_v10 = vrot.slane %v201_v7, 1 }
  0x51   :  { %v113_v5 = vadd.f32 %v112_v60, %v111_v55  ;;  %v126_v6 = vmax.f32 %v124_v56, %v125_v63  ;;  %v215_v14 = vrot.slane %v214_v8, 1 }
  0x52   :  { %v203_v17 = vadd.f32 %v202_v10, %v201_v7 }
  0x53   :  { %v116_v9 = vmin.f32 %v113_v5, %v115_v58  ;;  %vm127_vm8 = vcmp.ge.f32.partialorder %v117_v39, %v126_v6  ;;  %v216_v18 = vmax.f32 %v214_v8, %v215_v14  ;;  %v166_v39 = vmul.f32 %v431_v11, %v414_v33 }
  0x54   :  { %v128_v13 = vsel %vm127_vm8, 1.0, %v379_v34  ;;  %v206_v20 = vmin.f32 %v203_v17, %v205_v12 }
  0x55   :  { %v120_v15 = vadd.f32 %v116_v9, %v99_v41  ;;  %v129_v16 = vrot.slane %v128_v13, 4  ;;  %vm217_vm9 = vcmp.ge.f32.partialorder %v207_v49, %v216_v18  ;;  %v118_v38 = vmul.f32 %v116_v9, %v437_v29 }
  0x56   :  { %v218_v25 = vsel %vm217_vm9, 1.0, %v379_v34  ;;  %v210_v27 = vadd.f32 %v206_v20, %v189_v52  ;;  %v187_v41 = vmul.f32 %v185_v44, %v423_v62  ;;  %v208_v46 = vmul.f32 %v206_v20, %v441_v40 }
  0x57   :  { %v130_v19 = vadd.f32 %v129_v16, %v128_v13  ;;  %v135_v22 = vsub.f32 %v407_v0, %v120_v15  ;;  %v219_v28 = vrot.slane %v218_v25, 4  ;;  %v119_v36 = vadd.f32 %v118_v38, %v98_v37 }
  0x58   :  { %v225_v61 = vsub.f32 %v407_v0, %v210_v27  ;;  %v188_v43 = vadd.f32 %v187_v41, %v166_v39 }
  0x59   :  { %v131_v21 = vrot.slane %v130_v19, 2  ;;  %v136_v31 = vmax.f32 %v135_v22, 0.0  ;;  %v220_v35 = vadd.f32 %v219_v28, %v218_v25 }
  0x5a   :  { %v226_v48 = vmax.f32 %v225_v61, 0.0  ;;  %v209_v33 = vadd.f32 %v208_v46, %v188_v43 }
  0x5b   :  { %v132_v26 = vadd.f32 %v131_v21, %v130_v19  ;;  %v221_v32 = vrot.slane %v220_v35, 2 }
  0x5d   :  { %v133_v30 = vrot.slane %v132_v26, 1  ;;  %v222_v34 = vadd.f32 %v221_v32, %v220_v35 }
  0x5f   :  { %v134_v42 = vadd.f32 %v133_v30, %v132_v26  ;;  %v223_v47 = vrot.slane %v222_v34, 1 }
  0x61   :  { %v137_v3 = vmin.f32 %v134_v42, %v136_v31  ;;  %v224_v49 = vadd.f32 %v223_v47, %v222_v34 }
  0x63   :  { %v138_v45 = vmul.f32 %v137_v3, %v126_v6  ;;  %v227_v11 = vmin.f32 %v224_v49, %v226_v48 }
  0x65   :  { %v139_v29 = vadd.f32 %v138_v45, %v119_v36  ;;  %v228_v62 = vmul.f32 %v227_v11, %v216_v18 }
  0x67   :  { %v143_v44 = vmul.f32 %v141_v50, %v139_v29  ;;  %v229_v51 = vadd.f32 %v228_v62, %v209_v33 }
  0x69   :  { %v230_v52 = vmul.f32 %v229_v51, %v141_v50 }
  0x6b   :  { %v231_v53 = vmax.f32 %v143_v44, %v230_v52 }
  0x6d   :  { %v232_v54 = vsub.f32 %v143_v44, %v231_v53  ;;  %v235_v55 = vsub.f32 %v230_v52, %v231_v53 }
  0x6f   :  { %v233_v56 = vmul.f32 1.442695, %v232_v54  ;;  %v236_v57 = vmul.f32 1.442695, %v235_v55 }
  0x71   :  { %291 = vpow2.f32 %v233_v56 }
  0x72   :  { %293 = vpow2.f32 %v236_v57 }
  0x77   :  { %v292_v40 = vpop.eup %291 }
  0x78   :  { %v294_v58 = vpop.eup %293 }
  0x79   :  { %v238_v59 = vadd.f32 %v294_v58, %v292_v40 }
  0x7b   :  { %295 = vlog2.f32 %v238_v59 }
  0x81   :  { %v296_v60 = vpop.eup %295 }
  0x82   :  { %v240_v63 = vmul.f32 0.6931472, %v296_v60 }
  0x84   :  { %v241_v1 = vadd.f32 %v240_v63, %v231_v53 }
  0x86   :  { %v242_v2 = vsub.f32 %v143_v44, %v241_v1  ;;  %v247_v4 = vsub.f32 %v230_v52, %v241_v1 }
  0x88   :  { %v244_v5 = vrot.slane %v242_v2, 6  ;;  %v249_v6 = vrot.slane %v247_v4, 5 }
  0x8a   :  { %v246_v7 = vmul.f32 %v244_v5, %v407_v0  ;;  %v251_v8 = vmul.f32 %v249_v6, %v407_v0 }
  0x8c   :  { %v253_v9 = vrot.slane %v251_v8, 1 }
  0x8e   :  { %v255_v10 = vadd.f32 %v253_v9, %v246_v7 }
  0x90   :  { %v256_v12 = vsub.f32 0.0, %v255_v10 }
  0x92   :  { %257 = vst [vmem:[#allocation9 - $0x3] sm:$0x8] %v256_v12 }
  0x93   :  { %268 = dma.vmem_to_hbm [thread:$0]  %s264_s2, 16, %s266_s25, [#allocation6]  }
  0x94   :  { %373 = dma.done.wait [#allocation6], 16  }
  0x95   :  { %374 = vsyncadd [#allocation6], 4294967280 }
  0x96   :  { %273 = vsyncpa [#allocation5], 1 }
  0x97   :  { %274 = vsyncpa [#allocation8], 1 }
  0x98   :  { %275 = vsyncpa [#allocation6], 1 }

</bundles_post_ra>
